<compile_context>
chip_gen: v5e
topology: v5e:2x2
jax: 0.10.0
libtpu: 0.0.40
codegen_flags: <defaults>
</compile_context>

<pallas_src>
import functools

import jax
import jax.numpy as jnp
from jax.experimental import pallas as pl
from jax.experimental.pallas import tpu as pltpu

VMEM_SPEC = pl.BlockSpec(memory_space=pltpu.MemorySpace.VMEM)


# ----------------------------------------------------------------------------
# Kernel A: tiled  o = (tanh?(x)) @ w_bf16 + b   with K-reduction accumulator.
# ----------------------------------------------------------------------------
def _matmul_bias_kernel(x_ref, w_ref, b_ref, o_ref, acc_ref, *, apply_tanh):
    @pl.when(pl.program_id(2) == 0)
    def _():
        acc_ref[...] = jnp.zeros_like(acc_ref)

    x = x_ref[...]
    if apply_tanh:
        x = jnp.tanh(x)
    acc_ref[...] += jnp.dot(x.astype(jnp.bfloat16), w_ref[...],
                            preferred_element_type=jnp.float32)

    @pl.when(pl.program_id(2) == pl.num_programs(2) - 1)
    def _():
        o_ref[...] = (acc_ref[...] + b_ref[...]).astype(o_ref.dtype)


def tiled_linear_bf16(x, w_bf16, b, *, apply_tanh=False, tm=128, tn=256, tk=512):
    """x: (M, K) f32, w_bf16: (K, N) bf16, b: (1, N) f32 -> (M, N) f32."""
    m, k = x.shape
    _, n = w_bf16.shape
    tm = min(tm, m)
    tn = min(tn, n)
    tk = min(tk, k)
    assert m % tm == 0 and n % tn == 0 and k % tk == 0, (m, n, k, tm, tn, tk)
    grid = (m // tm, n // tn, k // tk)
    kernel = functools.partial(_matmul_bias_kernel, apply_tanh=apply_tanh)
    return pl.pallas_call(
        kernel,
        out_shape=jax.ShapeDtypeStruct((m, n), jnp.float32),
        grid_spec=pltpu.PrefetchScalarGridSpec(
            num_scalar_prefetch=0,
            grid=grid,
            in_specs=[
                pl.BlockSpec((tm, tk), lambda i, j, kk: (i, kk)),
                pl.BlockSpec((tk, tn), lambda i, j, kk: (kk, j)),
                pl.BlockSpec((1, tn), lambda i, j, kk: (0, j)),
            ],
            out_specs=pl.BlockSpec((tm, tn), lambda i, j, kk: (i, j)),
            scratch_shapes=[pltpu.VMEM((tm, tn), jnp.float32)],
        ),
        compiler_params=pltpu.CompilerParams(
            dimension_semantics=("parallel", "parallel", "arbitrary"),
            vmem_limit_bytes=32 * 1024 * 1024,
        ),
    )(x, w_bf16, b)


# ----------------------------------------------------------------------------
# Kernel B: 2-layer LSTM recurrence (input projection precomputed) + fused
#           tanh + fc epilogue.  Output: (N, embed) = fc(tanh([h0|c0|h1|c1])).
# ----------------------------------------------------------------------------
def _lstm2_fc_kernel(x_ref, whh0_ref, wih1_ref, whh1_ref, b1_ref,
                     fcw_ref, fcb_ref, o_ref, hc_ref, *, hidden):
    H = hidden
    hc_ref[...] = jnp.zeros_like(hc_ref)
    # Lane-aligned views into one scratch; matches torch.cat((h, c), 2)
    # .transpose(0, 1).reshape(N, -1) layout: [h_l0 | c_l0 | h_l1 | c_l1].
    h0 = hc_ref.at[:, 0 * H:1 * H]
    c0 = hc_ref.at[:, 1 * H:2 * H]
    h1 = hc_ref.at[:, 2 * H:3 * H]
    c1 = hc_ref.at[:, 3 * H:4 * H]
    T = x_ref.shape[0]

    def gates(g):
        i = jax.nn.sigmoid(g[:, 0 * H:1 * H])
        f = jax.nn.sigmoid(g[:, 1 * H:2 * H])
        gg = jnp.tanh(g[:, 2 * H:3 * H])
        o = jax.nn.sigmoid(g[:, 3 * H:4 * H])
        return i, f, gg, o

    def step(t, carry):
        # layer 0: x_ref[t] already holds tanh(emb_t) @ W_ih0 + (b_ih0 + b_hh0)
        g0 = x_ref[t] + jnp.dot(h0[...].astype(jnp.bfloat16), whh0_ref[...],
                                preferred_element_type=jnp.float32)
        i0, f0, gg0, o0 = gates(g0)
        c0_new = f0 * c0[...] + i0 * gg0
        h0_new = o0 * jnp.tanh(c0_new)
        c0[...] = c0_new
        h0[...] = h0_new
        # layer 1 (input = h0_new)
        g1 = (jnp.dot(h0_new.astype(jnp.bfloat16), wih1_ref[...],
                      preferred_element_type=jnp.float32)
              + jnp.dot(h1[...].astype(jnp.bfloat16), whh1_ref[...],
                        preferred_element_type=jnp.float32)
              + b1_ref[...])
        i1, f1, gg1, o1 = gates(g1)
        c1_new = f1 * c1[...] + i1 * gg1
        c1[...] = c1_new
        h1[...] = o1 * jnp.tanh(c1_new)
        return carry

    # T is small and static: fully unroll so the LLO scheduler can interleave
    # the per-step matmuls / EUP / VPU work across timesteps.
    jax.lax.fori_loop(0, T, step, 0, unroll=True)

    # Fused QstEncoder epilogue: tanh(hc) @ fc_w + fc_b  (no extra pallas_call).
    hc = jnp.tanh(hc_ref[...])
    o_ref[...] = (jnp.dot(hc.astype(jnp.bfloat16), fcw_ref[...],
                          preferred_element_type=jnp.float32)
                  + fcb_ref[...]).astype(o_ref.dtype)


def lstm2_fc(xproj, whh0, wih1, whh1, b1, fc_w, fc_b, hidden):
    t, n, _ = xproj.shape
    embed = fc_w.shape[1]
    kernel = functools.partial(_lstm2_fc_kernel, hidden=hidden)
    return pl.pallas_call(
        kernel,
        out_shape=jax.ShapeDtypeStruct((n, embed), jnp.float32),
        in_specs=[VMEM_SPEC] * 7,
        out_specs=VMEM_SPEC,
        scratch_shapes=[pltpu.VMEM((n, 4 * hidden), jnp.float32)],
        compiler_params=pltpu.CompilerParams(
            vmem_limit_bytes=32 * 1024 * 1024,
        ),
    )(xproj, whh0, wih1, whh1, b1, fc_w, fc_b)


# ----------------------------------------------------------------------------
# Full QstEncoder forward
# ----------------------------------------------------------------------------
def qst_encoder_forward(question, p, hidden_size):
    """question: (N, seq) int32 token ids (batch-first, as in the PyTorch call)."""
    n, seq = question.shape
    emb = jnp.take(p["word2vec"], question, axis=0)      # (N, seq, E)
    emb = jnp.transpose(emb, (1, 0, 2))                  # (seq, N, E)
    e = emb.shape[-1]
    x_flat = emb.reshape(seq * n, e)
    # tanh(word embedding) + layer-0 input projection hoisted out of the
    # recurrence as one big tiled matmul (better MXU occupancy than T tiny dots).
    xproj = tiled_linear_bf16(x_flat, p["wih0"], p["b0"], apply_tanh=True)
    xproj = xproj.reshape(seq, n, 4 * hidden_size)
    return lstm2_fc(xproj, p["whh0"], p["wih1"], p["whh1"], p["b1"],
                    p["fc_w"], p["fc_b"], hidden_size)


# ----------------------------------------------------------------------------
# Deterministic parameter construction (weights stored in bf16, biases f32)
# ----------------------------------------------------------------------------
def init_params(key, *, qst_vocab_size, word_embed_size, embed_size, hidden_size):
    # TODO(synk): num_layers is fixed at 2 (the model's configuration); to
    # generalize, stack per-layer weights and loop layers inside the kernel.
    ks = jax.random.split(key, 12)

    def nrm(k, shape, dtype=jnp.float32, scale=0.1):
        return (scale * jax.random.normal(k, shape, jnp.float32)).astype(dtype)

    H = hidden_size
    return {
        # Embedding(qst_vocab_size, word_embed_size)
        "word2vec": nrm(ks[0], (qst_vocab_size, word_embed_size)),
        # LSTM layer 0 (input word_embed_size), layer 1 (input hidden_size);
        # gate order (i, f, g, o); b* = b_ih + b_hh combined.
        "wih0": nrm(ks[1], (word_embed_size, 4 * H), jnp.bfloat16),
        "whh0": nrm(ks[2], (H, 4 * H), jnp.bfloat16),
        "b0": nrm(ks[3], (1, 4 * H)),
        "wih1": nrm(ks[4], (H, 4 * H), jnp.bfloat16),
        "whh1": nrm(ks[5], (H, 4 * H), jnp.bfloat16),
        "b1": nrm(ks[6], (1, 4 * H)),
        # fc: Linear(2 * num_layers * hidden, embed_size) = Linear(4H, embed)
        "fc_w": nrm(ks[7], (4 * H, embed_size), jnp.bfloat16),
        "fc_b": nrm(ks[8], (1, embed_size)),
    }


if __name__ == "__main__":
    # Small but lane/sublane-aligned shapes (H multiple of 128 keeps gate
    # slices and h/c scratch views on lane-tile boundaries).
    N = 8               # batch
    SEQ = 8             # question length
    QST_VOCAB = 32
    WORD_EMBED = 128    # word_embed_size (300 in original)
    HIDDEN = 128        # LSTM hidden_size (512 in original)
    EMBED = 256         # embed_size (1024 in original)

    key = jax.random.PRNGKey(0)
    k_qst, k_param = jax.random.split(key)

    question = jax.random.randint(k_qst, (N, SEQ), 0, QST_VOCAB, jnp.int32)
    params = init_params(
        k_param,
        qst_vocab_size=QST_VOCAB,
        word_embed_size=WORD_EMBED,
        embed_size=EMBED,
        hidden_size=HIDDEN,
    )

    out = qst_encoder_forward(question, params, HIDDEN)
    out = jax.block_until_ready(out)
    assert out.shape == (N, EMBED)
    assert bool(jnp.all(jnp.isfinite(out)))
    print("KERNEL_OK")
</pallas_src>

<mosaic_0001>
module attributes {stable_mosaic.version = 11 : i64} {
  func.func @_matmul_bias_kernel(%arg0: i32, %arg1: i32, %arg2: i32, %arg3: memref<64x128xf32, #tpu.memory_space<vmem>>, %arg4: memref<128x256xbf16, #tpu.memory_space<vmem>>, %arg5: memref<1x256xf32, #tpu.memory_space<vmem>>, %arg6: memref<64x256xf32, #tpu.memory_space<vmem>>, %arg7: memref<64x256xf32, #tpu.memory_space<vmem>>) attributes {dimension_semantics = [#tpu.dimension_semantics<parallel>, #tpu.dimension_semantics<parallel>, #tpu.dimension_semantics<arbitrary>], iteration_bounds = array<i64: 1, 2, 1>, scalar_prefetch = 0 : i64, scratch_operands = 1 : i64, tpu.core_type = #tpu.core_type<tc>, window_params = [{transform_indices = @transform_0, window_bounds = array<i64: 64, 128>}, {transform_indices = @transform_1, window_bounds = array<i64: 128, 256>}, {transform_indices = @transform_2, window_bounds = array<i64: 1, 256>}, {transform_indices = @transform_3, window_bounds = array<i64: 64, 256>}]} {
    %c0_i32 = arith.constant 0 : i32
    %0 = arith.cmpi eq, %arg2, %c0_i32 : i32
    %1 = arith.extui %0 : i1 to i32
    %c0_i32_0 = arith.constant 0 : i32
    %2 = arith.cmpi ne, %1, %c0_i32_0 : i32
    scf.if %2 {
      %cst_10 = arith.constant 0.000000e+00 : f32
      %14 = vector.broadcast %cst_10 : f32 to vector<64x256xf32>
      %c0_11 = arith.constant 0 : index
      %c0_12 = arith.constant 0 : index
      %15 = vector.load %arg7[%c0_11, %c0_12] : memref<64x256xf32, #tpu.memory_space<vmem>>, vector<64x256xf32>
      tpu.vector_store %arg7[%c0_11, %c0_12], %14 {strides = array<i32>} : memref<64x256xf32, #tpu.memory_space<vmem>>, vector<64x256xf32>,
    } else {
    }
    %c0 = arith.constant 0 : index
    %c0_1 = arith.constant 0 : index
    %3 = vector.load %arg3[%c0, %c0_1] : memref<64x128xf32, #tpu.memory_space<vmem>>, vector<64x128xf32>
    %4 = math.tanh %3 : vector<64x128xf32>
    %c0_2 = arith.constant 0 : index
    %c0_3 = arith.constant 0 : index
    %5 = vector.load %arg7[%c0_2, %c0_3] : memref<64x256xf32, #tpu.memory_space<vmem>>, vector<64x256xf32>
    %6 = arith.truncf %4 : vector<64x128xf32> to vector<64x128xbf16>
    %c0_4 = arith.constant 0 : index
    %c0_5 = arith.constant 0 : index
    %7 = vector.load %arg4[%c0_4, %c0_5] : memref<128x256xbf16, #tpu.memory_space<vmem>>, vector<128x256xbf16>
    %cst = arith.constant dense<0.000000e+00> : vector<64x256xf32>
    %8 = tpu.matmul %6, %7, %cst {dimension_numbers = #tpu.dot_dimension_numbers<[1], [0], [0], [1], [0, 0, 1, 1], [], []>} : vector<64x128xbf16>, vector<128x256xbf16>, vector<64x256xf32> -> vector<64x256xf32>
    %9 = arith.addf %5, %8 : vector<64x256xf32>
    %c0_6 = arith.constant 0 : index
    %c0_7 = arith.constant 0 : index
    %10 = vector.load %arg7[%c0_6, %c0_7] : memref<64x256xf32, #tpu.memory_space<vmem>>, vector<64x256xf32>
    tpu.vector_store %arg7[%c0_6, %c0_7], %9 {strides = array<i32>} : memref<64x256xf32, #tpu.memory_space<vmem>>, vector<64x256xf32>,
    %c0_i32_8 = arith.constant 0 : i32
    %11 = arith.cmpi eq, %arg2, %c0_i32_8 : i32
    %12 = arith.extui %11 : i1 to i32
    %c0_i32_9 = arith.constant 0 : i32
    %13 = arith.cmpi ne, %12, %c0_i32_9 : i32
    scf.if %13 {
      %c0_10 = arith.constant 0 : index
      %c0_11 = arith.constant 0 : index
      %14 = vector.load %arg7[%c0_10, %c0_11] : memref<64x256xf32, #tpu.memory_space<vmem>>, vector<64x256xf32>
      %c0_12 = arith.constant 0 : index
      %c0_13 = arith.constant 0 : index
      %15 = vector.load %arg5[%c0_12, %c0_13] : memref<1x256xf32, #tpu.memory_space<vmem>>, vector<1x256xf32>
      %16 = vector.broadcast %15 : vector<1x256xf32> to vector<64x256xf32>
      %17 = arith.addf %14, %16 : vector<64x256xf32>
      %c0_14 = arith.constant 0 : index
      %c0_15 = arith.constant 0 : index
      %18 = vector.load %arg6[%c0_14, %c0_15] : memref<64x256xf32, #tpu.memory_space<vmem>>, vector<64x256xf32>
      tpu.vector_store %arg6[%c0_14, %c0_15], %17 {strides = array<i32>} : memref<64x256xf32, #tpu.memory_space<vmem>>, vector<64x256xf32>,
    } else {
    }
    return
  }
  func.func @transform_0(%arg0: i32, %arg1: i32, %arg2: i32) -> (i32, i32) {
    %c0_i32 = arith.constant 0 : i32
    return %arg0, %arg2 : i32, i32
  }
  func.func @transform_1(%arg0: i32, %arg1: i32, %arg2: i32) -> (i32, i32) {
    %c0_i32 = arith.constant 0 : i32
    return %arg2, %arg1 : i32, i32
  }
  func.func @transform_2(%arg0: i32, %arg1: i32, %arg2: i32) -> (i32, i32) {
    %c0_i32 = arith.constant 0 : i32
    %c0_i32_0 = arith.constant 0 : i32
    return %c0_i32, %arg1 : i32, i32
  }
  func.func @transform_3(%arg0: i32, %arg1: i32, %arg2: i32) -> (i32, i32) {
    %c0_i32 = arith.constant 0 : i32
    return %arg0, %arg1 : i32, i32
  }
}

</mosaic_0001>

<bundles_post_ra>
// kernel: tpu_custom_call.1
= control target key start
LH: loop header
LB: loop body
LE: loop exit
PB: predicated region body
PF: predicated region fallthrough
CT: control target
= control target key end

     0   :  { %s1387_s0 = inlined_call_operand.hbm [shape: f32[64,128], index: 0, kind: input, shape index: {}]   ;;  %s1388_s1 = inlined_call_operand.hbm [shape: bf16[128,512], index: 1, kind: input, shape index: {}]   ;;  %s1389_s2 = inlined_call_operand.hbm [shape: f32[1,512], index: 2, kind: input, shape index: {}]   ;;  %s1390_s3 = inlined_call_operand.hbm [shape: f32[64,512], index: 3, kind: output, shape index: {}]  }
   0x1   :  { %1393 = sst [smem:[#allocation13_spill]] %s1387_s0 }
   0x2   :  { %1394 = sst [smem:[#allocation14_spill]] %s1388_s1 }
   0x3   :  { %8 = vsyncpa [#allocation4], 0 }
   0x4   :  { %9 = vsyncpa [#allocation7], 0 }
   0x5   :  { %11 = vsyncpa [#allocation7 + $0x1], 0 }
   0x6   :  { %12 = vsyncpa [#allocation5], 0 }
   0x7   :  { %14 = vsyncpa [#allocation5 + $0x1], 0  ;;  %s1154_s12 = smov 0   ;;  %s1156_s13 = smov 0  }
   0x8   :  { %s1158_s14 = smov 0   ;;  %s1160_s15 = smov 0  }
   0x9   :  { %s1162_s16 = smov 0   ;;  %s1164_s17 = smov 0  }
   0xa LB: > { %s35_s18 = sadd.s32 1, %s1121_s16  ;;  %s76_s19 = sadd.s32 1, %s1113_s14  ;;  %s1125_s17 = sphi %s1164_s17, %s20_s17   ;;  %s1121_s16 = sphi %s1162_s16, %s1409_s16   ;;  %s1117_s15 = sphi %s1160_s15, %s1408_s15   ;;  %s1113_s14 = sphi %s1158_s14, %s1407_s14   ;;  %s1109_s13 = sphi %s1156_s13, %s1406_s13   ;;  %s1105_s12 = sphi %s1154_s12, %s1405_s12  }
   0xb   : > { %p37_p0 = scmp.ge.s32.totalorder %s35_s18, 2  ;;  %p83_p1 = scmp.ne.s32.totalorder %s1113_s14, %s1109_s13 }
   0xc   : > { %p84_p2 = scmp.eq.s32.totalorder %s1125_s17, 0  ;;  %p735_p4 = scmp.ge.s32.totalorder %s1125_s17, 2 }
   0xd   : > { %s1411_s18 = smov (%p37_p0, %s35_s18), 0  ;;  %p875_p6 = scmp.lt.s32.totalorder %s1125_s17, 2 }
   0xe   : > { %p1194_p3 = por %p84_p2, %p83_p1  ;;  %s72_s21 = ssub.s32 %s1121_s16, %s1411_s18 }
   0xf   : > { %p74_p5 = scmp.eq.s32.totalorder %s72_s21, 0  ;;  %s185_s22 = sand.u32 1, %s1125_s17  }
  0x10   : > { %s187_s23 = sand.u32 1, %s1113_s14   ;;  %s815_s26 = sshll.u32 %s1121_s16, 3 }
  0x11   : > { %s1205_s24 = scalar_select %p74_p5, %s1113_s14, %s76_s19  }
  0x12   : > { %s736_s25 = sshll.u32 %s187_s23, 7  ;;  %s1396_s1 = sld [smem:[#allocation14_spill]] }
  0x13   : > { %s189_s30 = scalar_lea.vmem [#allocation6], %s736_s25  ;;  %p1215_p7 = pnand %p875_p6, %p1194_p3 }
  0x14   : > { %s200_s4 = sshll.u32 %s189_s30, 4  ;;  %s1219_s7 = scalar_lea.sflag [#allocation7], %s185_s22  ;;  %s201_s4 = int_to_ptr.vmem [resolvable:$true] %s200_s4 }
  0x15   : > { %s1127_s8 = smov 256   ;;  %s1391_s9 = smov 128  }
  0x16   : > { %s1392_s10 = smov 8   ;;  %s1227_s11 = sadd.s32 4294967295, %s1125_s17  }
  0x17   : > { %s732_s19 = sadd.s32 4294967294, %s1125_s17   ;;  %p89_p8 = scmp.ne.s32.totalorder %s1109_s13, %s1105_s12 }
  0x18   : > { %s197_s29 = scalar_lea.hbm %s1396_s1, %s815_s26  ;;  %p90_p9 = scmp.eq.s32.totalorder %s1227_s11, 0 }
  0x19   : > { %s198_s5 = sshll.u32 %s197_s29, 4  ;;  %p141_p10 = scmp.eq.s32.totalorder %s1227_s11, 1  ;;  %s199_s5 = int_to_ptr.hbm [resolvable:$true] %s198_s5 }
  0x1a   : > { %866 = dma.hbm_to_vmem [thread:$0]  (!%p1215_p7), %s199_s5, 2048, %s201_s4, %s1219_s7, %s1127_s8, %s1391_s9, %s1392_s10  }
  0x1b   : > { %p147_p11 = scmp.eq.s32.totalorder %s732_s19, 1  ;;  %p1236_p12 = por %p90_p9, %p89_p8 }
  0x1c   : > { %p733_p13 = scmp.ge.s32.totalorder %s1125_s17, 1  ;;  %p1244_p0 = por %p141_p10, %p83_p1 }
  0x1d   : > { %p1248_p2 = por %p147_p11, %p89_p8  ;;  %p154_p3 = scmp.lt.s32.totalorder %s1125_s17, 3 }
  0x1e   : > { %s1401_s0 = sld [smem:[#allocation13_spill]]  ;;  %s1130_s29 = smov [#allocation3]  }
  0x1f   : > { %p1256_p5 = pnand %p733_p13, %p154_p3  ;;  %s171_s30 = sshll.u32 %s1130_s29, 4  ;;  %s172_s30 = int_to_ptr.vmem [resolvable:$true] %s171_s30 }
  0x20   : > { %s739_s4 = sshll.u32 %s187_s23, 1  ;;  %s740_s5 = sshll.u32 %s1121_s16, 1 }
  0x21   : > { %p859_p1 = pneg %p1256_p5  ;;  %s218_s25 = scalar_lea.hbm %s1389_s2, %s740_s5 }
  0x22   : > { %s220_s26 = sshll.u32 %s218_s25, 4  ;;  %s214_s9 = scalar_lea.vmem [#allocation8], %s739_s4  ;;  %s221_s26 = int_to_ptr.hbm [resolvable:$true] %s220_s26 }
  0x23   : > { %p860_p6 = pnand %p859_p1, %p90_p9  ;;  %s222_s10 = sshll.u32 %s214_s9, 4  ;;  %s223_s10 = int_to_ptr.vmem [resolvable:$true] %s222_s10 }
  0x24   : > { %s169_s27 = sshll.u32 %s1401_s0, 4  ;;  %s1403_s0 = smov 8   ;;  %s170_s27 = int_to_ptr.hbm [resolvable:$true] %s169_s27 }
  0x25   : > { %s1404_s1 = smov 128   ;;  %231 = sbr.rel (%p1256_p5) target bundleno = 245 (0xf5), region = 32 }
  0x26   : > { %862 = dma.hbm_to_vmem [thread:$0]  (!%p860_p6), %s170_s27, 1024, %s172_s30, [#allocation4], %s1404_s1, %s1404_s1, %s1403_s0  }
  0x27   : > { %869 = dma.hbm_to_vmem [thread:$0]  (!%p1215_p7), %s221_s26, 32, %s223_s10, %s1219_s7  }
  0x2a   : > { %1092 = dma.done.wait (%p90_p9), [#allocation4], 1024  }
  0x2b   : > { %1094 = vsyncadd (%p90_p9), [#allocation4], 4294966272  ;;  %s238_s23 = sand.u32 1, %s1227_s11   ;;  %s1284_s9 = sand.u32 1, %s1109_s13  }
  0x2c   : > { %s743_s0 = sshll.u32 %s1284_s9, 7  ;;  %s239_s1 = scalar_lea.sflag [#allocation7], %s238_s23 }
  0x2d   : > { %s1289_s6 = scalar_lea.vmem [#allocation6], %s743_s0 }
  0x2e   : > { %1096 = dma.done.wait (%p1236_p12), %s239_s1, 2080  }
  0x2f   : > { %1098 = vsyncadd (%p1236_p12), %s239_s1, 4294965216  ;;  %v804_v0 = vld [vmem:[%s1289_s6 + $0x70] sm:$0xf]  ;;  %v831_v1 = vld [vmem:[%s1289_s6 + $0x74] sm:$0xf0]  ;;  %s744_s7 = sshll.u32 %s1284_s9, 1 }
  0x30   : > { %v830_v2 = vld [vmem:[%s1289_s6 + $0x74] sm:$0xf]  ;;  %v805_v3 = vor.u32 %v831_v1, %v804_v0  ;;  %v806_v4 = vld [vmem:[%s1289_s6 + $0x78] sm:$0xf0]  ;;  %v796_v5 = vld [vmem:[%s1289_s6 + $0x60] sm:$0xf] }
  0x31   : > { %v829_v6 = vld [vmem:[%s1289_s6 + $0x64] sm:$0xf0]  ;;  %v809_v7 = vor.u32 %v830_v2, %v806_v4  ;;  %v828_v8 = vld [vmem:[%s1289_s6 + $0x64] sm:$0xf]  ;;  %v798_v9 = vld [vmem:[%s1289_s6 + $0x68] sm:$0xf0] }
  0x32   : > { %439 = vmatpush.bf16.msra.mxu0 %v805_v3  ;;  %833 = vmatpush.bf16.msra.mxu2 %v805_v3  ;;  %v797_v10 = vor.u32 %v829_v6, %v796_v5  ;;  %v801_v11 = vor.u32 %v828_v8, %v798_v9  ;;  %v788_v12 = vld [vmem:[%s1289_s6 + $0x50] sm:$0xf]  ;;  %v827_v13 = vld [vmem:[%s1289_s6 + $0x54] sm:$0xf0]  ;;  %v826_v14 = vld [vmem:[%s1289_s6 + $0x54] sm:$0xf] }
  0x33   : > { %468 = vmatpush.bf16.msra.mxu1 %v809_v7  ;;  %841 = vmatpush.bf16.msra.mxu3 %v809_v7  ;;  %v790_v15 = vld [vmem:[%s1289_s6 + $0x58] sm:$0xf0]  ;;  %v789_v16 = vor.u32 %v827_v13, %v788_v12  ;;  %v780_v18 = vld [vmem:[%s1289_s6 + $0x40] sm:$0xf]  ;;  %v825_v19 = vld [vmem:[%s1289_s6 + $0x44] sm:$0xf0] }
  0x34   : > { %v793_v17 = vor.u32 %v826_v14, %v790_v15  ;;  %v824_v20 = vld [vmem:[%s1289_s6 + $0x44] sm:$0xf]  ;;  %v782_v21 = vld [vmem:[%s1289_s6 + $0x48] sm:$0xf0]  ;;  %v781_v22 = vor.u32 %v825_v19, %v780_v18  ;;  %v772_v24 = vld [vmem:[%s1289_s6 + $0x30] sm:$0xf] }
  0x35   : > { %v785_v23 = vor.u32 %v824_v20, %v782_v21  ;;  %v823_v25 = vld [vmem:[%s1289_s6 + $0x34] sm:$0xf0]  ;;  %v822_v26 = vld [vmem:[%s1289_s6 + $0x34] sm:$0xf]  ;;  %v774_v27 = vld [vmem:[%s1289_s6 + $0x38] sm:$0xf0] }
  0x36   : > { %440 = vmatpush.bf16.msra.mxu0 %v797_v10  ;;  %834 = vmatpush.bf16.msra.mxu2 %v797_v10  ;;  %v773_v28 = vor.u32 %v823_v25, %v772_v24  ;;  %v307_v29 = vld [vmem:[#allocation3] sm:$0xff]  ;;  %v777_v30 = vor.u32 %v822_v26, %v774_v27  ;;  %v821_v32 = vld [vmem:[%s1289_s6 + $0x24] sm:$0xf0]  ;;  %v766_v35 = vld [vmem:[%s1289_s6 + $0x28] sm:$0xf0]  ;;  %s252_s10 = scalar_lea.vmem [#allocation8], %s744_s7 }
  0x37   : > { %469 = vmatpush.bf16.msra.mxu1 %v801_v11  ;;  %842 = vmatpush.bf16.msra.mxu3 %v801_v11  ;;  %v764_v31 = vld [vmem:[%s1289_s6 + $0x20] sm:$0xf]  ;;  %v308_v33 = vld [vmem:[#allocation3 + $0x8] sm:$0xff]  ;;  %v820_v34 = vld [vmem:[%s1289_s6 + $0x24] sm:$0xf]  ;;  %933 = vtanh.f32 %v307_v29  ;;  %s1330_s11 = scalar_lea.vmem [#allocation9], %s743_s0 }
  0x38   : > { %v311_v36 = vld [vmem:[#allocation3 + $0x20] sm:$0xff]  ;;  %v312_v37 = vld [vmem:[#allocation3 + $0x28] sm:$0xff]  ;;  %v765_v38 = vor.u32 %v821_v32, %v764_v31  ;;  %935 = vtanh.f32 %v308_v33  ;;  %v769_v39 = vor.u32 %v820_v34, %v766_v35  ;;  %v756_v40 = vld [vmem:[%s1289_s6 + $0x10] sm:$0xf]  ;;  %s832_s20 = sshll.u32 %s1117_s15, 4  ;;  %s602_s30 = sshll.u32 %s1330_s11, 4  ;;  %s603_s30 = int_to_ptr.vmem [resolvable:$true] %s602_s30 }
  0x39   : > { %v819_v41 = vld [vmem:[%s1289_s6 + $0x14] sm:$0xf0]  ;;  %937 = vtanh.f32 %v311_v36  ;;  %v818_v42 = vld [vmem:[%s1289_s6 + $0x14] sm:$0xf]  ;;  %v758_v43 = vld [vmem:[%s1289_s6 + $0x18] sm:$0xf0]  ;;  %s601_s29 = scalar_lea.hbm %s1390_s3, %s832_s20 }
  0x3a   : > { %441 = vmatpush.bf16.msra.mxu0 %v789_v16  ;;  %835 = vmatpush.bf16.msra.mxu2 %v789_v16  ;;  %939 = vtanh.f32 %v312_v37  ;;  %v757_v44 = vor.u32 %v819_v41, %v756_v40  ;;  %v761_v46 = vor.u32 %v818_v42, %v758_v43  ;;  %v748_v47 = vld [vmem:[%s1289_s6] sm:$0xf]  ;;  %v817_v48 = vld [vmem:[%s1289_s6 + $0x4] sm:$0xf0]  ;;  %v816_v50 = vld [vmem:[%s1289_s6 + $0x4] sm:$0xf] }
  0x3b   : > { %470 = vmatpush.bf16.msra.mxu1 %v793_v17  ;;  %843 = vmatpush.bf16.msra.mxu3 %v793_v17  ;;  %v750_v51 = vld [vmem:[%s1289_s6 + $0x8] sm:$0xf0]  ;;  %v749_v54 = vor.u32 %v817_v48, %v748_v47  ;;  %v309_v58 = vld [vmem:[#allocation3 + $0x10] sm:$0xff]  ;;  %v310_v59 = vld [vmem:[#allocation3 + $0x18] sm:$0xff]  ;;  %s604_s15 = sshll.u32 %s601_s29, 4  ;;  %s587_s4 = scalar_lea.sflag [#allocation5], %s1284_s9  ;;  %s605_s15 = int_to_ptr.hbm [resolvable:$true] %s604_s15 }
  0x3c   : > { %v753_v55 = vor.u32 %v816_v50, %v750_v51  ;;  %v313_v60 = vld [vmem:[#allocation3 + $0x30] sm:$0xff]  ;;  %941 = vtanh.f32 %v309_v58  ;;  %v314_v61 = vld [vmem:[#allocation3 + $0x38] sm:$0xff]  ;;  %v548_v4 = vld [vmem:[%s252_s10] sm:$0x3]  ;;  %s1053_s5 = sshra.s32 %s605_s15, 4  ;;  %s1059_s26 = scalar_lea.hbm %s1390_s3, 256  ;;  %s1054_s5 = int_to_ptr.hbm [resolvable:$true] %s1053_s5 }
  0x3d   : > { %v934_v45 = vpop.eup %933  ;;  %943 = vtanh.f32 %v310_v59  ;;  %v550_v5 = vperm.slane %v548_v4, 0  ;;  %v551_v6 = vperm.slane %v548_v4, 1  ;;  %s1055_s8 = scalar_lea.hbm %s1054_s5, 128  ;;  %p1060_p10 = scmp.lt.s32.totalorder %s1054_s5, %s1390_s3 }
  0x3e   : > { %442 = vmatpush.bf16.msra.mxu0 %v781_v22  ;;  %836 = vmatpush.bf16.msra.mxu2 %v781_v22  ;;  %v936_v49 = vpop.eup %935  ;;  %945 = vtanh.f32 %v313_v60  ;;  %p1056_p7 = scmp.ne.s32.totalorder %s1054_s5, %s1055_s8  ;;  %p1061_p11 = scmp.lt.s32.totalorder %s1059_s26, %s1055_s8 }
  0x3f   : > { %471 = vmatpush.bf16.msra.mxu1 %v785_v23  ;;  %844 = vmatpush.bf16.msra.mxu3 %v785_v23  ;;  %v938_v52 = vpop.eup %937  ;;  %v339_v56 = vpack.c.bf16 %v936_v49, %v934_v45  ;;  %947 = vtanh.f32 %v314_v61 }
  0x40   : > { %v940_v53 = vpop.eup %939  ;;  %p1057_p8 = pnand %p1056_p7, %p1244_p0  ;;  %p1062_p12 = por %p1061_p11, %p1060_p10 }
  0x41   : > { %v341_v57 = vpack.c.bf16 %v940_v53, %v938_v52 }
  0x42   : > { %443 = vmatpush.bf16.msra.mxu0 %v773_v28  ;;  %837 = vmatpush.bf16.msra.mxu2 %v773_v28  ;;  %v942_v62 = vpop.eup %941  ;;  %p1058_p9 = pneg %p1057_p8 }
  0x43   : > { %472 = vmatpush.bf16.msra.mxu1 %v777_v30  ;;  %845 = vmatpush.bf16.msra.mxu3 %v777_v30  ;;  %v944_v63 = vpop.eup %943 }
  0x44   : > { %v946_v0 = vpop.eup %945  ;;  %v340_v2 = vpack.c.bf16 %v944_v63, %v942_v62  ;;  %p1063_p13 = pnand %p1062_p12, %p1058_p9 }
  0x45   : > { %v948_v1 = vpop.eup %947 }
  0x46   : > { %444 = vmatpush.bf16.msra.mxu0 %v765_v38  ;;  %838 = vmatpush.bf16.msra.mxu2 %v765_v38  ;;  %v342_v3 = vpack.c.bf16 %v948_v1, %v946_v0 }
  0x47   : > { %473 = vmatpush.bf16.msra.mxu1 %v769_v39  ;;  %846 = vmatpush.bf16.msra.mxu3 %v769_v39 }
  0x4a   : > { %445 = vmatpush.bf16.msra.mxu0 %v757_v44  ;;  %839 = vmatpush.bf16.msra.mxu2 %v757_v44 }
  0x4b   : > { %474 = vmatpush.bf16.msra.mxu1 %v761_v46  ;;  %847 = vmatpush.bf16.msra.mxu3 %v761_v46 }
  0x4e   : > { %446 = vmatpush.bf16.msra.mxu0 %v749_v54  ;;  %840 = vmatpush.bf16.msra.mxu2 %v749_v54 }
  0x4f   : > { %475 = vmatpush.bf16.msra.mxu1 %v753_v55  ;;  %848 = vmatpush.bf16.msra.mxu3 %v753_v55 }
  0x51   : > { %447 = vmatmul.bf16.vlgmr.msra.gmra.mxu0 %v339_v56  ;;  %457 = vmatmul.bf16.vlgmr.msra.gmra.mxu2 %v341_v57 }
  0x52   : > { %476 = vmatmul.bf16.vlgmr.msra.gmra.mxu1 %v339_v56  ;;  %486 = vmatmul.bf16.vlgmr.msra.gmra.mxu3 %v341_v57 }
  0x61   : > { %452 = vmatmul.bf16.gmra.mxu0 %v340_v2  ;;  %462 = vmatmul.bf16.gmra.mxu2 %v342_v3 }
  0x62   : > { %481 = vmatmul.bf16.gmra.mxu1 %v340_v2  ;;  %491 = vmatmul.bf16.gmra.mxu3 %v342_v3 }
  0xce   : > { %v448_v7 = vpop.f32.mrf.mxu0 }
  0xcf   : > { %v554_v8 = vadd.f32 %v550_v5, %v448_v7  ;;  %v477_v9 = vpop.f32.mrf.mxu1 }
  0xd0   : > { %v555_v10 = vadd.f32 %v551_v6, %v477_v9 }
  0xd1   : > { %570 = vst [vmem:[%s1330_s11] sm:$0xff] %v554_v8 }
  0xd2   : > { %571 = vst [vmem:[%s1330_s11 + $0x8] sm:$0xff] %v555_v10 }
  0xd4   : > { %v458_v11 = vpop.f32.mrf.mxu2 }
  0xd5   : > { %v562_v12 = vadd.f32 %v550_v5, %v458_v11  ;;  %v487_v13 = vpop.f32.mrf.mxu3 }
  0xd6   : > { %v563_v14 = vadd.f32 %v551_v6, %v487_v13  ;;  %v450_v15 = vpop.f32.mrf.mxu0 }
  0xd7   : > { %578 = vst [vmem:[%s1330_s11 + $0x40] sm:$0xff] %v562_v12  ;;  %v556_v16 = vadd.f32 %v550_v5, %v450_v15  ;;  %v479_v17 = vpop.f32.mrf.mxu1 }
  0xd8   : > { %579 = vst [vmem:[%s1330_s11 + $0x48] sm:$0xff] %v563_v14  ;;  %v557_v18 = vadd.f32 %v551_v6, %v479_v17 }
  0xd9   : > { %572 = vst [vmem:[%s1330_s11 + $0x10] sm:$0xff] %v556_v16 }
  0xda   : > { %573 = vst [vmem:[%s1330_s11 + $0x18] sm:$0xff] %v557_v18 }
  0xdc   : > { %v460_v19 = vpop.f32.mrf.mxu2 }
  0xdd   : > { %v564_v20 = vadd.f32 %v550_v5, %v460_v19  ;;  %v489_v21 = vpop.f32.mrf.mxu3 }
  0xde   : > { %v565_v22 = vadd.f32 %v551_v6, %v489_v21  ;;  %v453_v23 = vpop.f32.mrf.mxu0 }
  0xdf   : > { %580 = vst [vmem:[%s1330_s11 + $0x50] sm:$0xff] %v564_v20  ;;  %v558_v24 = vadd.f32 %v550_v5, %v453_v23  ;;  %v482_v25 = vpop.f32.mrf.mxu1 }
  0xe0   : > { %581 = vst [vmem:[%s1330_s11 + $0x58] sm:$0xff] %v565_v22  ;;  %v559_v26 = vadd.f32 %v551_v6, %v482_v25 }
  0xe1   : > { %574 = vst [vmem:[%s1330_s11 + $0x20] sm:$0xff] %v558_v24 }
  0xe2   : > { %575 = vst [vmem:[%s1330_s11 + $0x28] sm:$0xff] %v559_v26 }
  0xe4   : > { %v463_v27 = vpop.f32.mrf.mxu2 }
  0xe5   : > { %v566_v28 = vadd.f32 %v550_v5, %v463_v27  ;;  %v492_v29 = vpop.f32.mrf.mxu3 }
  0xe6   : > { %v567_v30 = vadd.f32 %v551_v6, %v492_v29  ;;  %v455_v31 = vpop.f32.mrf.mxu0 }
  0xe7   : > { %582 = vst [vmem:[%s1330_s11 + $0x60] sm:$0xff] %v566_v28  ;;  %v560_v32 = vadd.f32 %v550_v5, %v455_v31  ;;  %v484_v33 = vpop.f32.mrf.mxu1 }
  0xe8   : > { %583 = vst [vmem:[%s1330_s11 + $0x68] sm:$0xff] %v567_v30  ;;  %v561_v34 = vadd.f32 %v551_v6, %v484_v33 }
  0xe9   : > { %576 = vst [vmem:[%s1330_s11 + $0x30] sm:$0xff] %v560_v32 }
  0xea   : > { %577 = vst [vmem:[%s1330_s11 + $0x38] sm:$0xff] %v561_v34 }
  0xec   : > { %v465_v35 = vpop.f32.mrf.mxu2 }
  0xed   : > { %v568_v36 = vadd.f32 %v550_v5, %v465_v35  ;;  %v494_v37 = vpop.f32.mrf.mxu3 }
  0xee   : > { %v569_v38 = vadd.f32 %v551_v6, %v494_v37 }
  0xef   : > { %584 = vst [vmem:[%s1330_s11 + $0x70] sm:$0xff] %v568_v36 }
  0xf0   : > { %585 = vst [vmem:[%s1330_s11 + $0x78] sm:$0xff] %v569_v38 }
  0xf1   : > { %1066 = shalt.err (!%p1063_p13)
}
  0xf2   : > { %s1131_s9 = smov 256   ;;  %s1132_s1 = smov 512  }
  0xf3   : > { %s1133_s6 = smov 16  }
  0xf4   : > { %857 = dma.vmem_to_hbm [thread:$0]  (%p1244_p0), %s603_s30, 2048, %s605_s15, %s587_s4, %s1131_s9, %s1132_s1, %s1133_s6  }
  0xf5 PF: > { %s619_s7 = sand.u32 1, %s1105_s12   ;;  %p871_p3 = pnand %p735_p4, %p1248_p2 }
  0xf6   : > { %s620_s10 = scalar_lea.sflag [#allocation5], %s619_s7 }
  0xf7   : > { %p872_p5 = pneg %p871_p3 }
  0xf9   : > { %1100 = dma.done.wait (%p872_p5), %s620_s10, 2048  }
  0xfa   : > { %1102 = vsyncadd (%p872_p5), %s620_s10, 4294965248  ;;  %s20_s17 = sadd.s32 1, %s1125_s17   ;;  %s1405_s12 = smov %s1109_s13 }
  0xfb   : > { %p17_p1 = scmp.ge.s32.totalorder %s20_s17, 4   ;;  %s1406_s13 = smov %s1113_s14 }
  0xfc   : > { %s1407_s14 = smov %s1205_s24  ;;  %s1408_s15 = smov %s1121_s16 }
  0xfd   : > { %s1409_s16 = smov %s1411_s18  ;;  %19 = sbr.rel (!%p17_p1) target bundleno = 10 (0xa), region = 102 }
 0x102   :  { %626 = vsyncpa [#allocation4], 1 }
 0x103   :  { %628 = vsyncpa [#allocation4 + $0x1], 1 }
 0x104   :  { %629 = vsyncpa [#allocation7], 1 }
 0x105   :  { %631 = vsyncpa [#allocation7 + $0x1], 1 }
 0x106   :  { %632 = vsyncpa [#allocation5], 1 }
 0x107   :  { %634 = vsyncpa [#allocation5 + $0x1], 1 }

</bundles_post_ra>
